<compile_context>
chip_gen: v7x
topology: tpu7x:2x2x1
jax: 0.10.0
libtpu: 0.0.40
codegen_flags: <defaults>
</compile_context>

<pallas_src>
import jax
import jax.numpy as jnp
from jax.experimental import pallas as pl
from jax.experimental.pallas import tpu as pltpu

BATCH_PAD = 8  # sublane-aligned batch tile carried through the whole kernel


def rnn_fc_kernel(x_ref,      # (B, T, D)   raw batch-first input
                  wih0_ref,   # (D, H)      layer-0 input weight (pre-transposed)
                  whh0_ref,   # (H, H)      layer-0 hidden weight (pre-transposed)
                  wih1_ref,   # (H, H)      layer-1 input weight (pre-transposed)
                  whh1_ref,   # (H, H)      layer-1 hidden weight (pre-transposed)
                  b0_ref,     # (1, H)      bih0 + bhh0
                  b1_ref,     # (BP, H)     bih1 + bhh1, pre-tiled to 8 sublanes
                  wfc_ref,    # (H, Opad)   fc weight (pre-transposed, lane-padded)
                  bfc_ref,    # (1, Opad)   fc bias (lane-padded)
                  out_ref,    # (BP, Opad)
                  xw0_ref):   # (BP*T, H)   VMEM scratch: batched layer-0 projection
    B, T, D = x_ref.shape
    H = whh0_ref.shape[0]
    BP = out_ref.shape[0]

    # Hoist all weight / bias reads out of the recurrence (read once).
    wih0 = wih0_ref[...]
    whh0 = whh0_ref[...]
    wih1 = wih1_ref[...]
    whh1 = whh1_ref[...]
    b1 = b1_ref[...]

    # ---- off the serial critical path ---------------------------------------
    # Sublane-pad the batch to BP (padded rows compute bounded garbage that
    # never mixes into real rows) and project every timestep through layer-0's
    # input weight in ONE batched matmul, bias folded in.  The result is kept
    # in VMEM scratch (batch-major: row index = b*T + t) so each per-step
    # operand is a plain sublane-strided VMEM load - no vector shuffles near
    # the recurrence.
    xb = x_ref[...].reshape(B * T, D)
    if B < BP:
        xb = jnp.concatenate(
            [xb, jnp.zeros(((BP - B) * T, D), xb.dtype)], axis=0)   # (BP*T, D)
    xw0_ref[...] = (jnp.dot(xb, wih0, preferred_element_type=jnp.float32)
                    + b0_ref[...])                                  # (BP*T, H)

    # ---- serial recurrence ---------------------------------------------------
    # TODO(synk): on v6e/v7x, casting weights + hidden state to bf16 (keeping
    # f32 accumulation and f32 tanh) would shorten each in-loop matmul; kept
    # f32 here to preserve the 1e-4 match against the f32 reference.
    h0 = jnp.zeros((BP, H), jnp.float32)
    h1 = jnp.zeros((BP, H), jnp.float32)
    for t in range(T):   # T small & static -> fully unrolled, static indexing
        # timestep-t rows for all BP batch slots (stride T over sublanes)
        x_t = xw0_ref[pl.ds(t, BP, stride=T), :]                    # (BP, H)
        # layer-1 hidden-hidden term depends only on h1_{t-1}: it schedules in
        # parallel with the layer-0 chain, off the tanh(h0_t)-dependent path.
        a1 = jnp.dot(h1, whh1, preferred_element_type=jnp.float32)
        # layer 0: h0_t = tanh(x_t W_ih0^T + b0 + h0_{t-1} W_hh0^T)
        h0 = jnp.tanh(x_t + jnp.dot(h0, whh0,
                                    preferred_element_type=jnp.float32))
        # layer 1: the only matmul waiting on tanh(h0_t) has K = H (not 2H).
        h1 = jnp.tanh(a1 + b1 + jnp.dot(h0, wih1,
                                        preferred_element_type=jnp.float32))

    # fc head on the last timestep's top-layer hidden state: lane-dense,
    # full-sublane (BP, Opad) unmasked store.
    out_ref[...] = (jnp.dot(h1, wfc_ref[...],
                            preferred_element_type=jnp.float32) + bfc_ref[...])


def pack_params(params):
    """One-time packing of RNN/FC parameters into the kernel's layout.

    Done once at init so the per-call graph is just the pallas_call plus a
    single output slice (no per-call transposes / concats / pads).
    """
    H = params["whh0"].shape[0]
    O = params["wfc"].shape[0]
    Opad = ((O + 127) // 128) * 128
    f32 = jnp.float32
    packed = (
        jnp.asarray(params["wih0"].T, f32),                                # (D, H)
        jnp.asarray(params["whh0"].T, f32),                                # (H, H)
        jnp.asarray(params["wih1"].T, f32),                                # (H, H)
        jnp.asarray(params["whh1"].T, f32),                                # (H, H)
        jnp.asarray((params["bih0"] + params["bhh0"])[None, :], f32),      # (1, H)
        jnp.tile(jnp.asarray((params["bih1"] + params["bhh1"])[None, :], f32),
                 (BATCH_PAD, 1)),                                          # (BP, H)
        jnp.zeros((H, Opad), f32).at[:, :O].set(params["wfc"].T),          # (H, Opad)
        jnp.zeros((1, Opad), f32).at[:, :O].set(params["bfc"]),            # (1, Opad)
    )
    packed = tuple(jax.block_until_ready(a) for a in packed)
    return packed, O


def rnn_forward(x, packed, output_size):
    """x: (B, T, D) float32, batch_first (PyTorch convention). Returns (B, O)."""
    B, T, D = x.shape
    assert B <= BATCH_PAD, "kernel carries a single sublane-padded batch tile"
    H = packed[1].shape[0]
    Opad = packed[-1].shape[-1]

    vmem = pl.BlockSpec(memory_space=pltpu.MemorySpace.VMEM)
    out = pl.pallas_call(
        rnn_fc_kernel,
        out_shape=jax.ShapeDtypeStruct((BATCH_PAD, Opad), jnp.float32),
        in_specs=[vmem] * (1 + len(packed)),
        out_specs=vmem,
        scratch_shapes=[pltpu.VMEM((BATCH_PAD * T, H), jnp.float32)],
    )(x, *packed)
    return out[:B, :output_size]
    # TODO(synk): at realistic (T, B, D) switch to a time-chunked grid carrying
    # h0/h1 in VMEM scratch ("arbitrary" time axis) with a leading "parallel"
    # batch axis for v7x's two TensorCores, and re-derive block sizes against
    # v7x's 64 MiB VMEM; unnecessary at these toy shapes.


def rnn_forward_ref(x, params):
    """Pure-JAX reference (mirrors torch.nn.RNN(num_layers=2) + Linear)."""
    B, T, D = x.shape
    H = params["whh0"].shape[0]
    h0 = jnp.zeros((B, H), jnp.float32)
    h1 = jnp.zeros((B, H), jnp.float32)
    for t in range(T):
        x_t = x[:, t, :]
        h0 = jnp.tanh(x_t @ params["wih0"].T + params["bih0"]
                      + h0 @ params["whh0"].T + params["bhh0"])
        h1 = jnp.tanh(h0 @ params["wih1"].T + params["bih1"]
                      + h1 @ params["whh1"].T + params["bhh1"])
    return h1 @ params["wfc"].T + params["bfc"]


def init_params(key, input_size, hidden_size, output_size):
    """Deterministic init mimicking PyTorch's U(-1/sqrt(H), 1/sqrt(H))."""
    ks = jax.random.split(key, 12)
    kr = 1.0 / jnp.sqrt(hidden_size)
    u = lambda k, shape, s: jax.random.uniform(k, shape, jnp.float32, -s, s)
    return {
        "wih0": u(ks[0], (hidden_size, input_size), kr),
        "whh0": u(ks[1], (hidden_size, hidden_size), kr),
        "bih0": u(ks[2], (hidden_size,), kr),
        "bhh0": u(ks[3], (hidden_size,), kr),
        "wih1": u(ks[4], (hidden_size, hidden_size), kr),
        "whh1": u(ks[5], (hidden_size, hidden_size), kr),
        "bih1": u(ks[6], (hidden_size,), kr),
        "bhh1": u(ks[7], (hidden_size,), kr),
        "wfc":  u(ks[8], (output_size, hidden_size), kr),
        "bfc":  u(ks[9], (output_size,), kr),
    }


if __name__ == "__main__":
    # Shapes consistent with the module: batch=2, seq=8, features=4,
    # hidden_size=64 (per spec), num_layers=2 (hard-coded in kernel), output=3.
    B, T, D, H, O = 2, 8, 4, 64, 3

    key = jax.random.PRNGKey(0)
    kx, kp = jax.random.split(key)
    x = jax.random.normal(kx, (B, T, D), jnp.float32)
    params = init_params(kp, D, H, O)

    packed, out_size = pack_params(params)     # one-time weight packing
    out = rnn_forward(x, packed, out_size)
    out = jax.block_until_ready(out)

    ref = rnn_forward_ref(x, params)
    assert out.shape == (B, O)
    assert jnp.allclose(out, ref, rtol=1e-4, atol=1e-4), "kernel mismatch vs reference"

    print("KERNEL_OK")
</pallas_src>

<mosaic_0001>
module attributes {stable_mosaic.version = 11 : i64} {
  func.func @rnn_fc_kernel(%arg0: memref<2x8x4xf32, #tpu.memory_space<vmem>>, %arg1: memref<4x64xf32, #tpu.memory_space<vmem>>, %arg2: memref<64x64xf32, #tpu.memory_space<vmem>>, %arg3: memref<64x64xf32, #tpu.memory_space<vmem>>, %arg4: memref<64x64xf32, #tpu.memory_space<vmem>>, %arg5: memref<1x64xf32, #tpu.memory_space<vmem>>, %arg6: memref<8x64xf32, #tpu.memory_space<vmem>>, %arg7: memref<64x128xf32, #tpu.memory_space<vmem>>, %arg8: memref<1x128xf32, #tpu.memory_space<vmem>>, %arg9: memref<8x128xf32, #tpu.memory_space<vmem>>, %arg10: memref<64x64xf32, #tpu.memory_space<vmem>>) attributes {dimension_semantics = [], scalar_prefetch = 0 : i64, scratch_operands = 1 : i64, tpu.core_type = #tpu.core_type<tc>} {
    %c0 = arith.constant 0 : index
    %c0_0 = arith.constant 0 : index
    %0 = vector.load %arg1[%c0, %c0_0] : memref<4x64xf32, #tpu.memory_space<vmem>>, vector<4x64xf32>
    %c0_1 = arith.constant 0 : index
    %c0_2 = arith.constant 0 : index
    %1 = vector.load %arg2[%c0_1, %c0_2] : memref<64x64xf32, #tpu.memory_space<vmem>>, vector<64x64xf32>
    %c0_3 = arith.constant 0 : index
    %c0_4 = arith.constant 0 : index
    %2 = vector.load %arg3[%c0_3, %c0_4] : memref<64x64xf32, #tpu.memory_space<vmem>>, vector<64x64xf32>
    %c0_5 = arith.constant 0 : index
    %c0_6 = arith.constant 0 : index
    %3 = vector.load %arg4[%c0_5, %c0_6] : memref<64x64xf32, #tpu.memory_space<vmem>>, vector<64x64xf32>
    %c0_7 = arith.constant 0 : index
    %c0_8 = arith.constant 0 : index
    %4 = vector.load %arg6[%c0_7, %c0_8] : memref<8x64xf32, #tpu.memory_space<vmem>>, vector<8x64xf32>
    %c0_9 = arith.constant 0 : index
    %c0_10 = arith.constant 0 : index
    %c0_11 = arith.constant 0 : index
    %5 = vector.load %arg0[%c0_9, %c0_10, %c0_11] : memref<2x8x4xf32, #tpu.memory_space<vmem>>, vector<2x8x4xf32>
    %6 = vector.shape_cast %5 : vector<2x8x4xf32> to vector<16x4xf32>
    %cst = arith.constant 0.000000e+00 : f32
    %7 = vector.broadcast %cst : f32 to vector<48x4xf32>
    %8 = tpu.concatenate %6, %7 in 0 : vector<16x4xf32>, vector<48x4xf32> -> vector<64x4xf32>
    %cst_12 = arith.constant dense<0.000000e+00> : vector<64x64xf32>
    %9 = tpu.matmul %8, %0, %cst_12 {dimension_numbers = #tpu.dot_dimension_numbers<[1], [0], [0], [1], [0, 0, 1, 1], [], []>} : vector<64x4xf32>, vector<4x64xf32>, vector<64x64xf32> -> vector<64x64xf32>
    %c0_13 = arith.constant 0 : index
    %c0_14 = arith.constant 0 : index
    %10 = vector.load %arg5[%c0_13, %c0_14] : memref<1x64xf32, #tpu.memory_space<vmem>>, vector<1x64xf32>
    %11 = vector.broadcast %10 : vector<1x64xf32> to vector<64x64xf32>
    %12 = arith.addf %9, %11 : vector<64x64xf32>
    %c0_15 = arith.constant 0 : index
    %c0_16 = arith.constant 0 : index
    %13 = vector.load %arg10[%c0_15, %c0_16] : memref<64x64xf32, #tpu.memory_space<vmem>>, vector<64x64xf32>
    tpu.vector_store %arg10[%c0_15, %c0_16], %12 {strides = array<i32>} : memref<64x64xf32, #tpu.memory_space<vmem>>, vector<64x64xf32>,
    %cst_17 = arith.constant 0.000000e+00 : f32
    %14 = vector.broadcast %cst_17 : f32 to vector<8x64xf32>
    %cst_18 = arith.constant 0.000000e+00 : f32
    %15 = vector.broadcast %cst_18 : f32 to vector<8x64xf32>
    %c0_19 = arith.constant 0 : index
    %c0_20 = arith.constant 0 : index
    %16 = tpu.strided_load %arg10[%c0_19, %c0_20] {strides = array<i32: 8, 1>} : memref<64x64xf32, #tpu.memory_space<vmem>>, vector<8x64xf32>
    %cst_21 = arith.constant dense<0.000000e+00> : vector<8x64xf32>
    %17 = tpu.matmul %15, %3, %cst_21 {dimension_numbers = #tpu.dot_dimension_numbers<[1], [0], [0], [1], [0, 0, 1, 1], [], []>} : vector<8x64xf32>, vector<64x64xf32>, vector<8x64xf32> -> vector<8x64xf32>
    %cst_22 = arith.constant dense<0.000000e+00> : vector<8x64xf32>
    %18 = tpu.matmul %14, %1, %cst_22 {dimension_numbers = #tpu.dot_dimension_numbers<[1], [0], [0], [1], [0, 0, 1, 1], [], []>} : vector<8x64xf32>, vector<64x64xf32>, vector<8x64xf32> -> vector<8x64xf32>
    %19 = arith.addf %16, %18 : vector<8x64xf32>
    %20 = math.tanh %19 : vector<8x64xf32>
    %21 = arith.addf %17, %4 : vector<8x64xf32>
    %cst_23 = arith.constant dense<0.000000e+00> : vector<8x64xf32>
    %22 = tpu.matmul %20, %2, %cst_23 {dimension_numbers = #tpu.dot_dimension_numbers<[1], [0], [0], [1], [0, 0, 1, 1], [], []>} : vector<8x64xf32>, vector<64x64xf32>, vector<8x64xf32> -> vector<8x64xf32>
    %23 = arith.addf %21, %22 : vector<8x64xf32>
    %24 = math.tanh %23 : vector<8x64xf32>
    %c1 = arith.constant 1 : index
    %c0_24 = arith.constant 0 : index
    %25 = tpu.strided_load %arg10[%c1, %c0_24] {strides = array<i32: 8, 1>} : memref<64x64xf32, #tpu.memory_space<vmem>>, vector<8x64xf32>
    %cst_25 = arith.constant dense<0.000000e+00> : vector<8x64xf32>
    %26 = tpu.matmul %24, %3, %cst_25 {dimension_numbers = #tpu.dot_dimension_numbers<[1], [0], [0], [1], [0, 0, 1, 1], [], []>} : vector<8x64xf32>, vector<64x64xf32>, vector<8x64xf32> -> vector<8x64xf32>
    %cst_26 = arith.constant dense<0.000000e+00> : vector<8x64xf32>
    %27 = tpu.matmul %20, %1, %cst_26 {dimension_numbers = #tpu.dot_dimension_numbers<[1], [0], [0], [1], [0, 0, 1, 1], [], []>} : vector<8x64xf32>, vector<64x64xf32>, vector<8x64xf32> -> vector<8x64xf32>
    %28 = arith.addf %25, %27 : vector<8x64xf32>
    %29 = math.tanh %28 : vector<8x64xf32>
    %30 = arith.addf %26, %4 : vector<8x64xf32>
    %cst_27 = arith.constant dense<0.000000e+00> : vector<8x64xf32>
    %31 = tpu.matmul %29, %2, %cst_27 {dimension_numbers = #tpu.dot_dimension_numbers<[1], [0], [0], [1], [0, 0, 1, 1], [], []>} : vector<8x64xf32>, vector<64x64xf32>, vector<8x64xf32> -> vector<8x64xf32>
    %32 = arith.addf %30, %31 : vector<8x64xf32>
    %33 = math.tanh %32 : vector<8x64xf32>
    %c2 = arith.constant 2 : index
    %c0_28 = arith.constant 0 : index
    %34 = tpu.strided_load %arg10[%c2, %c0_28] {strides = array<i32: 8, 1>} : memref<64x64xf32, #tpu.memory_space<vmem>>, vector<8x64xf32>
    %cst_29 = arith.constant dense<0.000000e+00> : vector<8x64xf32>
    %35 = tpu.matmul %33, %3, %cst_29 {dimension_numbers = #tpu.dot_dimension_numbers<[1], [0], [0], [1], [0, 0, 1, 1], [], []>} : vector<8x64xf32>, vector<64x64xf32>, vector<8x64xf32> -> vector<8x64xf32>
    %cst_30 = arith.constant dense<0.000000e+00> : vector<8x64xf32>
    %36 = tpu.matmul %29, %1, %cst_30 {dimension_numbers = #tpu.dot_dimension_numbers<[1], [0], [0], [1], [0, 0, 1, 1], [], []>} : vector<8x64xf32>, vector<64x64xf32>, vector<8x64xf32> -> vector<8x64xf32>
    %37 = arith.addf %34, %36 : vector<8x64xf32>
    %38 = math.tanh %37 : vector<8x64xf32>
    %39 = arith.addf %35, %4 : vector<8x64xf32>
    %cst_31 = arith.constant dense<0.000000e+00> : vector<8x64xf32>
    %40 = tpu.matmul %38, %2, %cst_31 {dimension_numbers = #tpu.dot_dimension_numbers<[1], [0], [0], [1], [0, 0, 1, 1], [], []>} : vector<8x64xf32>, vector<64x64xf32>, vector<8x64xf32> -> vector<8x64xf32>
    %41 = arith.addf %39, %40 : vector<8x64xf32>
    %42 = math.tanh %41 : vector<8x64xf32>
    %c3 = arith.constant 3 : index
    %c0_32 = arith.constant 0 : index
    %43 = tpu.strided_load %arg10[%c3, %c0_32] {strides = array<i32: 8, 1>} : memref<64x64xf32, #tpu.memory_space<vmem>>, vector<8x64xf32>
    %cst_33 = arith.constant dense<0.000000e+00> : vector<8x64xf32>
    %44 = tpu.matmul %42, %3, %cst_33 {dimension_numbers = #tpu.dot_dimension_numbers<[1], [0], [0], [1], [0, 0, 1, 1], [], []>} : vector<8x64xf32>, vector<64x64xf32>, vector<8x64xf32> -> vector<8x64xf32>
    %cst_34 = arith.constant dense<0.000000e+00> : vector<8x64xf32>
    %45 = tpu.matmul %38, %1, %cst_34 {dimension_numbers = #tpu.dot_dimension_numbers<[1], [0], [0], [1], [0, 0, 1, 1], [], []>} : vector<8x64xf32>, vector<64x64xf32>, vector<8x64xf32> -> vector<8x64xf32>
    %46 = arith.addf %43, %45 : vector<8x64xf32>
    %47 = math.tanh %46 : vector<8x64xf32>
    %48 = arith.addf %44, %4 : vector<8x64xf32>
    %cst_35 = arith.constant dense<0.000000e+00> : vector<8x64xf32>
    %49 = tpu.matmul %47, %2, %cst_35 {dimension_numbers = #tpu.dot_dimension_numbers<[1], [0], [0], [1], [0, 0, 1, 1], [], []>} : vector<8x64xf32>, vector<64x64xf32>, vector<8x64xf32> -> vector<8x64xf32>
    %50 = arith.addf %48, %49 : vector<8x64xf32>
    %51 = math.tanh %50 : vector<8x64xf32>
    %c4 = arith.constant 4 : index
    %c0_36 = arith.constant 0 : index
    %52 = tpu.strided_load %arg10[%c4, %c0_36] {strides = array<i32: 8, 1>} : memref<64x64xf32, #tpu.memory_space<vmem>>, vector<8x64xf32>
    %cst_37 = arith.constant dense<0.000000e+00> : vector<8x64xf32>
    %53 = tpu.matmul %51, %3, %cst_37 {dimension_numbers = #tpu.dot_dimension_numbers<[1], [0], [0], [1], [0, 0, 1, 1], [], []>} : vector<8x64xf32>, vector<64x64xf32>, vector<8x64xf32> -> vector<8x64xf32>
    %cst_38 = arith.constant dense<0.000000e+00> : vector<8x64xf32>
    %54 = tpu.matmul %47, %1, %cst_38 {dimension_numbers = #tpu.dot_dimension_numbers<[1], [0], [0], [1], [0, 0, 1, 1], [], []>} : vector<8x64xf32>, vector<64x64xf32>, vector<8x64xf32> -> vector<8x64xf32>
    %55 = arith.addf %52, %54 : vector<8x64xf32>
    %56 = math.tanh %55 : vector<8x64xf32>
    %57 = arith.addf %53, %4 : vector<8x64xf32>
    %cst_39 = arith.constant dense<0.000000e+00> : vector<8x64xf32>
    %58 = tpu.matmul %56, %2, %cst_39 {dimension_numbers = #tpu.dot_dimension_numbers<[1], [0], [0], [1], [0, 0, 1, 1], [], []>} : vector<8x64xf32>, vector<64x64xf32>, vector<8x64xf32> -> vector<8x64xf32>
    %59 = arith.addf %57, %58 : vector<8x64xf32>
    %60 = math.tanh %59 : vector<8x64xf32>
    %c5 = arith.constant 5 : index
    %c0_40 = arith.constant 0 : index
    %61 = tpu.strided_load %arg10[%c5, %c0_40] {strides = array<i32: 8, 1>} : memref<64x64xf32, #tpu.memory_space<vmem>>, vector<8x64xf32>
    %cst_41 = arith.constant dense<0.000000e+00> : vector<8x64xf32>
    %62 = tpu.matmul %60, %3, %cst_41 {dimension_numbers = #tpu.dot_dimension_numbers<[1], [0], [0], [1], [0, 0, 1, 1], [], []>} : vector<8x64xf32>, vector<64x64xf32>, vector<8x64xf32> -> vector<8x64xf32>
    %cst_42 = arith.constant dense<0.000000e+00> : vector<8x64xf32>
    %63 = tpu.matmul %56, %1, %cst_42 {dimension_numbers = #tpu.dot_dimension_numbers<[1], [0], [0], [1], [0, 0, 1, 1], [], []>} : vector<8x64xf32>, vector<64x64xf32>, vector<8x64xf32> -> vector<8x64xf32>
    %64 = arith.addf %61, %63 : vector<8x64xf32>
    %65 = math.tanh %64 : vector<8x64xf32>
    %66 = arith.addf %62, %4 : vector<8x64xf32>
    %cst_43 = arith.constant dense<0.000000e+00> : vector<8x64xf32>
    %67 = tpu.matmul %65, %2, %cst_43 {dimension_numbers = #tpu.dot_dimension_numbers<[1], [0], [0], [1], [0, 0, 1, 1], [], []>} : vector<8x64xf32>, vector<64x64xf32>, vector<8x64xf32> -> vector<8x64xf32>
    %68 = arith.addf %66, %67 : vector<8x64xf32>
    %69 = math.tanh %68 : vector<8x64xf32>
    %c6 = arith.constant 6 : index
    %c0_44 = arith.constant 0 : index
    %70 = tpu.strided_load %arg10[%c6, %c0_44] {strides = array<i32: 8, 1>} : memref<64x64xf32, #tpu.memory_space<vmem>>, vector<8x64xf32>
    %cst_45 = arith.constant dense<0.000000e+00> : vector<8x64xf32>
    %71 = tpu.matmul %69, %3, %cst_45 {dimension_numbers = #tpu.dot_dimension_numbers<[1], [0], [0], [1], [0, 0, 1, 1], [], []>} : vector<8x64xf32>, vector<64x64xf32>, vector<8x64xf32> -> vector<8x64xf32>
    %cst_46 = arith.constant dense<0.000000e+00> : vector<8x64xf32>
    %72 = tpu.matmul %65, %1, %cst_46 {dimension_numbers = #tpu.dot_dimension_numbers<[1], [0], [0], [1], [0, 0, 1, 1], [], []>} : vector<8x64xf32>, vector<64x64xf32>, vector<8x64xf32> -> vector<8x64xf32>
    %73 = arith.addf %70, %72 : vector<8x64xf32>
    %74 = math.tanh %73 : vector<8x64xf32>
    %75 = arith.addf %71, %4 : vector<8x64xf32>
    %cst_47 = arith.constant dense<0.000000e+00> : vector<8x64xf32>
    %76 = tpu.matmul %74, %2, %cst_47 {dimension_numbers = #tpu.dot_dimension_numbers<[1], [0], [0], [1], [0, 0, 1, 1], [], []>} : vector<8x64xf32>, vector<64x64xf32>, vector<8x64xf32> -> vector<8x64xf32>
    %77 = arith.addf %75, %76 : vector<8x64xf32>
    %78 = math.tanh %77 : vector<8x64xf32>
    %c7 = arith.constant 7 : index
    %c0_48 = arith.constant 0 : index
    %79 = tpu.strided_load %arg10[%c7, %c0_48] {strides = array<i32: 8, 1>} : memref<64x64xf32, #tpu.memory_space<vmem>>, vector<8x64xf32>
    %cst_49 = arith.constant dense<0.000000e+00> : vector<8x64xf32>
    %80 = tpu.matmul %78, %3, %cst_49 {dimension_numbers = #tpu.dot_dimension_numbers<[1], [0], [0], [1], [0, 0, 1, 1], [], []>} : vector<8x64xf32>, vector<64x64xf32>, vector<8x64xf32> -> vector<8x64xf32>
    %cst_50 = arith.constant dense<0.000000e+00> : vector<8x64xf32>
    %81 = tpu.matmul %74, %1, %cst_50 {dimension_numbers = #tpu.dot_dimension_numbers<[1], [0], [0], [1], [0, 0, 1, 1], [], []>} : vector<8x64xf32>, vector<64x64xf32>, vector<8x64xf32> -> vector<8x64xf32>
    %82 = arith.addf %79, %81 : vector<8x64xf32>
    %83 = math.tanh %82 : vector<8x64xf32>
    %84 = arith.addf %80, %4 : vector<8x64xf32>
    %cst_51 = arith.constant dense<0.000000e+00> : vector<8x64xf32>
    %85 = tpu.matmul %83, %2, %cst_51 {dimension_numbers = #tpu.dot_dimension_numbers<[1], [0], [0], [1], [0, 0, 1, 1], [], []>} : vector<8x64xf32>, vector<64x64xf32>, vector<8x64xf32> -> vector<8x64xf32>
    %86 = arith.addf %84, %85 : vector<8x64xf32>
    %87 = math.tanh %86 : vector<8x64xf32>
    %c0_52 = arith.constant 0 : index
    %c0_53 = arith.constant 0 : index
    %88 = vector.load %arg7[%c0_52, %c0_53] : memref<64x128xf32, #tpu.memory_space<vmem>>, vector<64x128xf32>
    %cst_54 = arith.constant dense<0.000000e+00> : vector<8x128xf32>
    %89 = tpu.matmul %87, %88, %cst_54 {dimension_numbers = #tpu.dot_dimension_numbers<[1], [0], [0], [1], [0, 0, 1, 1], [], []>} : vector<8x64xf32>, vector<64x128xf32>, vector<8x128xf32> -> vector<8x128xf32>
    %c0_55 = arith.constant 0 : index
    %c0_56 = arith.constant 0 : index
    %90 = vector.load %arg8[%c0_55, %c0_56] : memref<1x128xf32, #tpu.memory_space<vmem>>, vector<1x128xf32>
    %91 = vector.broadcast %90 : vector<1x128xf32> to vector<8x128xf32>
    %92 = arith.addf %89, %91 : vector<8x128xf32>
    %c0_57 = arith.constant 0 : index
    %c0_58 = arith.constant 0 : index
    %93 = vector.load %arg9[%c0_57, %c0_58] : memref<8x128xf32, #tpu.memory_space<vmem>>, vector<8x128xf32>
    tpu.vector_store %arg9[%c0_57, %c0_58], %92 {strides = array<i32>} : memref<8x128xf32, #tpu.memory_space<vmem>>, vector<8x128xf32>,
    return
  }
}

</mosaic_0001>

<bundles_post_ra>
// kernel: tpu_custom_call.1
= control target key start
LH: loop header
LB: loop body
LE: loop exit
PB: predicated region body
PF: predicated region fallthrough
CT: control target
= control target key end

     0   :  { %14 = vsyncpa [#allocation4], 0  ;;  %s3865_s0 = inlined_call_operand.vmem [shape: f32[2,8,4], index: 0, kind: input, shape index: {}]   ;;  %s3866_s1 = inlined_call_operand.vmem [shape: f32[4,64], index: 1, kind: input, shape index: {}]   ;;  %s3867_s2 = inlined_call_operand.hbm [shape: f32[64,64], index: 2, kind: input, shape index: {}]   ;;  %s3868_s3 = inlined_call_operand.hbm [shape: f32[64,64], index: 3, kind: input, shape index: {}]   ;;  %s3869_s4 = inlined_call_operand.hbm [shape: f32[64,64], index: 4, kind: input, shape index: {}]   ;;  %s3870_s5 = inlined_call_operand.vmem [shape: f32[1,64], index: 5, kind: input, shape index: {}]   ;;  %s3871_s6 = inlined_call_operand.vmem [shape: f32[8,64], index: 6, kind: input, shape index: {}]   ;;  %s3872_s7 = inlined_call_operand.hbm [shape: f32[64,128], index: 7, kind: input, shape index: {}]   ;;  %s3873_s8 = inlined_call_operand.vmem [shape: f32[1,128], index: 8, kind: input, shape index: {}]   ;;  %s3874_s9 = inlined_call_operand.hbm [shape: f32[8,128], index: 9, kind: output, shape index: {}]  }
   0x1   :  { %15 = vsyncpa [#allocation7], 0 }
   0x2   :  { %16 = vsyncpa [#allocation10], 0 }
   0x3   :  { %17 = vsyncpa [#allocation5], 0  ;;  %s3382_s30 = smov [#allocation6]   ;;  %s3383_s11 = smov [#allocation3]  }
   0x4   :  { %s39_s10 = sshll.u32 %s3382_s30, 4  ;;  %s27_s12 = sshll.u32 %s3383_s11, 4  ;;  %s40_s10 = int_to_ptr.vmem [resolvable:$true] %s39_s10  ;;  %s3442_s12 = int_to_ptr.vmem [resolvable:$true] %s27_s12 }
   0x5   :  { %s3264_s15 = scalar_lea.hbm %s3868_s3, 1024 }
   0x6   :  { %p3265_p0 = scmp.ne.s32.totalorder %s3868_s3, %s3264_s15  ;;  %p3268_p1 = scmp.lt.u32.totalorder %s3264_s15, %s3868_s3 }
   0x8   :  { %p3270_p2 = pnand %p3268_p1, %p3265_p0 }
   0xa   :  { %3273 = shalt.err (!%p3270_p2)
}
   0xb   :  { %s3274_s20 = scalar_lea.vmem %s40_s10, 1024  ;;  %p3279_p4 = scmp.lt.s32.totalorder %s40_s10, %s40_s10 }
   0xc   :  { %p3275_p3 = scmp.ne.s32.totalorder %s40_s10, %s3274_s20  ;;  %p3280_p5 = scmp.lt.s32.totalorder %s3274_s20, %s3274_s20 }
   0xe   :  { %p3281_p6 = por %p3280_p5, %p3279_p4 }
  0x10   :  { %p3282_p7 = pnand %p3281_p6, %p3275_p3 }
  0x12   :  { %3285 = shalt.err (!%p3282_p7)
}
  0x13   :  { %s3384_s21 = smov 128   ;;  %s3385_s22 = smov 8  }
  0x14   :  { %45 = dma.hbm_to_vmem [thread:$0]  %s3868_s3, 1024, %s40_s10, [#allocation7], %s3384_s21, %s3384_s21, %s3385_s22  }
  0x15   :  { %s3286_s27 = scalar_lea.hbm %s3867_s2, 1024 }
  0x16   :  { %p3287_p8 = scmp.ne.s32.totalorder %s3867_s2, %s3286_s27  ;;  %p3290_p9 = scmp.lt.u32.totalorder %s3286_s27, %s3867_s2 }
  0x18   :  { %p3292_p10 = pnand %p3290_p9, %p3287_p8 }
  0x1a   :  { %3295 = shalt.err (!%p3292_p10)
}
  0x1b   :  { %s3296_s13 = scalar_lea.vmem %s3442_s12, 1024  ;;  %p3301_p12 = scmp.lt.s32.totalorder %s3442_s12, %s3442_s12 }
  0x1c   :  { %p3297_p11 = scmp.ne.s32.totalorder %s3442_s12, %s3296_s13  ;;  %p3302_p13 = scmp.lt.s32.totalorder %s3296_s13, %s3296_s13 }
  0x1e   :  { %p3303_p0 = por %p3302_p13, %p3301_p12 }
  0x20   :  { %p3304_p1 = pnand %p3303_p0, %p3297_p11 }
  0x22   :  { %3307 = shalt.err (!%p3304_p1)
}
  0x23   :  { %33 = dma.hbm_to_vmem [thread:$0]  %s3867_s2, 1024, %s3442_s12, [#allocation4], %s3384_s21, %s3384_s21, %s3385_s22  }
  0x24   :  { %s3386_s14 = smov [#allocation8]   ;;  %s3387_s16 = smov [#allocation9]  }
  0x25   :  { %s51_s15 = sshll.u32 %s3386_s14, 4  ;;  %s67_s17 = sshll.u32 %s3387_s16, 4  ;;  %s52_s15 = int_to_ptr.vmem [resolvable:$true] %s51_s15  ;;  %s3479_s17 = int_to_ptr.vmem [resolvable:$true] %s67_s17 }
  0x26   :  { %s3308_s20 = scalar_lea.hbm %s3869_s4, 1024 }
  0x27   :  { %p3309_p2 = scmp.ne.s32.totalorder %s3869_s4, %s3308_s20  ;;  %p3312_p3 = scmp.lt.u32.totalorder %s3308_s20, %s3869_s4 }
  0x29   :  { %p3314_p4 = pnand %p3312_p3, %p3309_p2 }
  0x2b   :  { %3317 = shalt.err (!%p3314_p4)
}
  0x2c   :  { %s3318_s2 = scalar_lea.vmem %s52_s15, 1024  ;;  %p3323_p6 = scmp.lt.s32.totalorder %s52_s15, %s52_s15 }
  0x2d   :  { %p3319_p5 = scmp.ne.s32.totalorder %s52_s15, %s3318_s2  ;;  %p3324_p7 = scmp.lt.s32.totalorder %s3318_s2, %s3318_s2 }
  0x2f   :  { %p3325_p8 = por %p3324_p7, %p3323_p6 }
  0x31   :  { %p3326_p9 = pnand %p3325_p8, %p3319_p5 }
  0x33   :  { %3329 = shalt.err (!%p3326_p9)
}
  0x34   :  { %57 = dma.hbm_to_vmem [thread:$0]  %s3869_s4, 1024, %s52_s15, [#allocation7], %s3384_s21, %s3384_s21, %s3385_s22  }
  0x35   :  { %s3330_s30 = scalar_lea.hbm %s3872_s7, 1024 }
  0x36   :  { %p3331_p10 = scmp.ne.s32.totalorder %s3872_s7, %s3330_s30  ;;  %p3334_p11 = scmp.lt.u32.totalorder %s3330_s30, %s3872_s7 }
  0x38   :  { %p3336_p12 = pnand %p3334_p11, %p3331_p10 }
  0x3a   :  { %3339 = shalt.err (!%p3336_p12)
}
  0x3b   :  { %s3340_s14 = scalar_lea.vmem %s3479_s17, 1024  ;;  %p3345_p0 = scmp.lt.s32.totalorder %s3479_s17, %s3479_s17 }
  0x3c   :  { %p3341_p13 = scmp.ne.s32.totalorder %s3479_s17, %s3340_s14  ;;  %p3346_p1 = scmp.lt.s32.totalorder %s3340_s14, %s3340_s14 }
  0x3e   :  { %p3347_p2 = por %p3346_p1, %p3345_p0 }
  0x40   :  { %p3348_p3 = pnand %p3347_p2, %p3341_p13 }
  0x42   :  { %3351 = shalt.err (!%p3348_p3)
}
  0x43   :  { %73 = dma.hbm_to_vmem [thread:$0]  %s3872_s7, 1024, %s3479_s17, [#allocation10], %s3384_s21, %s3384_s21, %s3385_s22  }
  0x44   :  { %3374 = dma.done.wait [#allocation4], 1024  }
  0x45   :  { %3375 = vsyncadd [#allocation4], 4294966272 }
  0x46   :  { %3376 = dma.done.wait [#allocation7], 2048  }
  0x47   :  { %3377 = vsyncadd [#allocation7], 4294965248 }
  0x48   :  { %3378 = dma.done.wait [#allocation10], 1024  }
  0x49   :  { %3379 = vsyncadd [#allocation10], 4294966272  ;;  %v3388_v0 = vmov 0.0|0.0   ;;  %vm3389_vm0 = vmmov 0   ;;  %v3390_v1 = vmov 0.0   ;;  %vm133_vm1 = vcmask 1043456  }
  0x4a   :  { %2898 = vmatprep.subr.bf16.mxu1 %v3388_v0  ;;  %2439 = vmatprep.mubr.msk.f32.mxu1 %vm3389_vm0, %v3390_v1  ;;  %vm123_vm2 = vcmask 31744   ;;  %v88_v2 = vld [vmem:[%s3866_s1] sm:$0xf]  ;;  %v115_v4 = vld [vmem:[%s3865_s0 + $0x8] sm:$0xff]  ;;  %v89_v5 = vld [vmem:[#allocation3] sm:$0xff]  ;;  %vm242_vm3 = vcmask 523264  }
  0x4b   :  { %v114_v3 = vld [vmem:[%s3865_s0] sm:$0xff]  ;;  %2409 = vmatprep.subr.msk.mxu0 %vm133_vm1, %v88_v2  ;;  %v90_v6 = vld [vmem:[#allocation3 + $0x8] sm:$0xff]  ;;  %v92_v9 = vld [vmem:[#allocation3 + $0x18] sm:$0xff]  ;;  %s3391_s23 = smov [#allocation11]  }
  0x4c   :  { %2411 = vmatprep.mubr.msk.f32.mxu0 %vm123_vm2, %v114_v3  ;;  %v91_v7 = vld [vmem:[#allocation3 + $0x10] sm:$0xff]  ;;  %2410 = vmatpush3.msk.msra.mxu0 %vm133_vm1, %v88_v2  ;;  %v3528_v8 = vpack.c.bf16 %v90_v6, %v89_v5  ;;  %v93_v11 = vld [vmem:[#allocation3 + $0x20] sm:$0xff]  ;;  %v94_v12 = vld [vmem:[#allocation3 + $0x28] sm:$0xff]  ;;  %s2136_s24 = sshll.u32 %s3391_s23, 4  ;;  %s2137_s24 = int_to_ptr.vmem [resolvable:$true] %s2136_s24 }
  0x4d   :  { %2412 = vmatmul.mubr.msk.f32.vlgmr.msra.gmra.mrb[0].mxu0 %vm123_vm2, %v115_v4  ;;  %2910 = vmatprep.subr.bf16.mxu0 %v3388_v0  ;;  %v3533_v10 = vpack.c.bf16 %v92_v9, %v91_v7  ;;  %v3539_v13 = vpack.c.bf16 %v94_v12, %v93_v11  ;;  %v95_v14 = vld [vmem:[#allocation3 + $0x30] sm:$0xff]  ;;  %v96_v15 = vld [vmem:[#allocation3 + $0x38] sm:$0xff]  ;;  %v105_v17 = vld [vmem:[#allocation8] sm:$0xff]  ;;  %s3352_s25 = scalar_lea.vmem %s2137_s24, 128  ;;  %p3357_p5 = scmp.lt.s32.totalorder %s2137_s24, %s2137_s24 }
  0x4e   :  { %2414 = vmatprep.mubr.f32.mxu0 %v3390_v1  ;;  %2900 = vmatpush3.bf16.msra.mxu1 %v3528_v8  ;;  %v3545_v16 = vpack.c.bf16 %v96_v15, %v95_v14  ;;  %v106_v18 = vld [vmem:[#allocation8 + $0x8] sm:$0xff]  ;;  %v107_v20 = vld [vmem:[#allocation8 + $0x10] sm:$0xff]  ;;  %v108_v21 = vld [vmem:[#allocation8 + $0x18] sm:$0xff]  ;;  %p3353_p4 = scmp.ne.s32.totalorder %s2137_s24, %s3352_s25  ;;  %p3358_p6 = scmp.lt.s32.totalorder %s3352_s25, %s3352_s25 }
  0x4f   :  { %2901 = vmatprep.subr.bf16.mxu1 %v3388_v0  ;;  %v3564_v19 = vpack.c.bf16 %v106_v18, %v105_v17  ;;  %v3568_v22 = vpack.c.bf16 %v108_v21, %v107_v20  ;;  %v109_v23 = vld [vmem:[#allocation8 + $0x20] sm:$0xff]  ;;  %v110_v24 = vld [vmem:[#allocation8 + $0x28] sm:$0xff]  ;;  %v111_v26 = vld [vmem:[#allocation8 + $0x30] sm:$0xff] }
  0x50   :  { %v3572_v25 = vpack.c.bf16 %v110_v24, %v109_v23  ;;  %v112_v27 = vld [vmem:[#allocation8 + $0x38] sm:$0xff]  ;;  %v97_v29 = vld [vmem:[#allocation6] sm:$0xff]  ;;  %v98_v30 = vld [vmem:[#allocation6 + $0x8] sm:$0xff]  ;;  %p3359_p7 = por %p3358_p6, %p3357_p5 }
  0x51   :  { %2415 = vmatmul.mubr.f32.gmra.mrb[2].mxu0 %v3390_v1  ;;  %v3576_v28 = vpack.c.bf16 %v112_v27, %v111_v26  ;;  %v3580_v31 = vpack.c.bf16 %v98_v30, %v97_v29  ;;  %v99_v32 = vld [vmem:[#allocation6 + $0x10] sm:$0xff]  ;;  %v100_v33 = vld [vmem:[#allocation6 + $0x18] sm:$0xff]  ;;  %v101_v35 = vld [vmem:[#allocation6 + $0x20] sm:$0xff] }
  0x52   :  { %2417 = vmatprep.mubr.f32.mxu0 %v3390_v1  ;;  %2903 = vmatpush3.bf16.msra.mxu1 %v3533_v10  ;;  %v3587_v34 = vpack.c.bf16 %v100_v33, %v99_v32  ;;  %v102_v36 = vld [vmem:[#allocation6 + $0x28] sm:$0xff]  ;;  %v103_v38 = vld [vmem:[#allocation6 + $0x30] sm:$0xff]  ;;  %v104_v39 = vld [vmem:[#allocation6 + $0x38] sm:$0xff]  ;;  %p3360_p8 = pnand %p3359_p7, %p3353_p4 }
  0x53   :  { %2904 = vmatprep.subr.bf16.mxu1 %v3388_v0  ;;  %2912 = vmatpush3.bf16.msra.mxu0 %v3564_v19  ;;  %v3591_v37 = vpack.c.bf16 %v102_v36, %v101_v35  ;;  %v3594_v40 = vpack.c.bf16 %v104_v39, %v103_v38  ;;  %v2147_v41 = vld [vmem:[%s3870_s5] ss:$0 sm:$0xff] }
  0x54   :  { %2913 = vmatprep.subr.bf16.mxu0 %v3388_v0  ;;  %v3635_v4 = vld [vmem:[%s3871_s6] sm:$0xff] }
  0x55   :  { %2418 = vmatmul.mubr.f32.gmra.mrb[4].mxu0 %v3390_v1 }
  0x56   :  { %2420 = vmatprep.mubr.f32.mxu0 %v3390_v1  ;;  %2906 = vmatpush3.bf16.msra.mxu1 %v3539_v13 }
  0x57   :  { %2907 = vmatprep.subr.bf16.mxu1 %v3388_v0  ;;  %2915 = vmatpush3.bf16.msra.mxu0 %v3568_v22 }
  0x58   :  { %2916 = vmatprep.subr.bf16.mxu0 %v3388_v0 }
  0x59   :  { %2421 = vmatmul.mubr.f32.gmra.mrb[6].mxu0 %v3390_v1 }
  0x5a   :  { %2909 = vmatpush3.bf16.msra.mxu1 %v3545_v16  ;;  %2458 = vmatprep.mubr.msk.f32.mxu0 %vm3389_vm0, %v3390_v1 }
  0x5b   :  { %2934 = vmatprep.subr.bf16.mxu1 %v3388_v0  ;;  %2918 = vmatpush3.bf16.msra.mxu0 %v3572_v25 }
  0x5c   :  { %2919 = vmatprep.subr.bf16.mxu0 %v3388_v0 }
  0x5d   :  { %2440 = vmatmul.mubr.f32.vlgmr.msra.gmra.mrb[0].mxu1 %v3390_v1 }
  0x5e   :  { %2936 = vmatpush3.bf16.msra.mxu1 %v3528_v8  ;;  %2496 = vmatprep.mubr.msk.f32.mxu1 %vm3389_vm0, %v3390_v1 }
  0x5f   :  { %2937 = vmatprep.subr.bf16.mxu1 %v3388_v0  ;;  %2921 = vmatpush3.bf16.msra.mxu0 %v3576_v28 }
  0x60   :  { %2922 = vmatprep.subr.bf16.mxu0 %v3388_v0 }
  0x62   :  { %2939 = vmatpush3.bf16.msra.mxu1 %v3533_v10  ;;  %2459 = vmatmul.mubr.f32.vlgmr.msra.gmra.mrb[8].mxu0 %v3390_v1 }
  0x63   :  { %2940 = vmatprep.subr.bf16.mxu1 %v3388_v0  ;;  %2924 = vmatpush3.bf16.msra.mxu0 %v3580_v31 }
  0x64   :  { %2477 = vmatprep.mubr.msk.f32.mxu0 %vm3389_vm0, %v3390_v1  ;;  %2925 = vmatprep.subr.bf16.mxu0 %v3388_v0 }
  0x66   :  { %2942 = vmatpush3.bf16.msra.mxu1 %v3539_v13 }
  0x67   :  { %2943 = vmatprep.subr.bf16.mxu1 %v3388_v0  ;;  %2927 = vmatpush3.bf16.msra.mxu0 %v3587_v34 }
  0x68   :  { %2928 = vmatprep.subr.bf16.mxu0 %v3388_v0 }
  0x6a   :  { %2945 = vmatpush3.bf16.msra.mxu1 %v3545_v16 }
  0x6b   :  { %2946 = vmatprep.subr.bf16.mxu1 %v3388_v0  ;;  %2930 = vmatpush3.bf16.msra.mxu0 %v3591_v37 }
  0x6c   :  { %2931 = vmatprep.subr.bf16.mxu0 %v3388_v0 }
  0x6f   :  { %2933 = vmatpush3.bf16.msra.mxu0 %v3594_v40 }
  0x70   :  { %2970 = vmatprep.subr.bf16.mxu0 %v3388_v0 }
 0x120   :  { %v2413_v42 = vpop.f32.mrb[0].mxu0 }
 0x121   :  { %v209_v43 = vadd.f32 %v2413_v42, %v2147_v41  ;;  %v203_v44 = vpop.f32.mrb[1].mxu0 }
 0x122   :  { %v204_v45 = vadd.f32 %v2147_v41, %v203_v44 }
 0x123   :  { %244 = vst.msk [vmem:[#allocation2 + $0x8] sm:$0xff] %vm242_vm3, %v209_v43 }
 0x124   :  { %243 = vst.msk [vmem:[#allocation2] sm:$0xff] %vm242_vm3, %v204_v45  ;;  %v2416_v46 = vpop.f32.mrb[2].mxu0 }
 0x125   :  { %v219_v47 = vadd.f32 %v2416_v46, %v2147_v41  ;;  %v213_v48 = vpop.f32.mrb[3].mxu0 }
 0x126   :  { %v214_v49 = vadd.f32 %v2147_v41, %v213_v48 }
 0x127   :  { %246 = vst.msk [vmem:[#allocation2 + $0x18] sm:$0xff] %vm242_vm3, %v219_v47 }
 0x128   :  { %245 = vst.msk [vmem:[#allocation2 + $0x10] sm:$0xff] %vm242_vm3, %v214_v49  ;;  %v2419_v50 = vpop.f32.mrb[4].mxu0 }
 0x129   :  { %v229_v51 = vadd.f32 %v2419_v50, %v2147_v41  ;;  %v223_v52 = vpop.f32.mrb[5].mxu0 }
 0x12a   :  { %v224_v53 = vadd.f32 %v2147_v41, %v223_v52 }
 0x12b   :  { %248 = vst.msk [vmem:[#allocation2 + $0x28] sm:$0xff] %vm242_vm3, %v229_v51 }
 0x12c   :  { %247 = vst.msk [vmem:[#allocation2 + $0x20] sm:$0xff] %vm242_vm3, %v224_v53  ;;  %v2422_v54 = vpop.f32.mrb[6].mxu0 }
 0x12d   :  { %v239_v55 = vadd.f32 %v2422_v54, %v2147_v41  ;;  %v233_v56 = vpop.f32.mrb[7].mxu0 }
 0x12e   :  { %v234_v57 = vadd.f32 %v2147_v41, %v233_v56 }
 0x12f   :  { %250 = vst.msk [vmem:[#allocation2 + $0x38] sm:$0xff] %vm242_vm3, %v239_v55  ;;  %v251_v60 = vld [vmem:[#allocation2] ss:$8 sm:$0xf] }
 0x130   :  { %249 = vst.msk [vmem:[#allocation2 + $0x30] sm:$0xff] %vm242_vm3, %v234_v57  ;;  %v322_v58 = vpop.f32.mrb[0].mxu1  ;;  %v474_v5 = vld [vmem:[#allocation2 + $0x1] ss:$8 sm:$0xf] }
 0x131   :  { %v2441_v59 = vpop.f32.mrb[1].mxu1  ;;  %v698_v21 = vld [vmem:[#allocation2 + $0x2] ss:$8 sm:$0xf] }
 0x132   :  { %v922_v38 = vld [vmem:[#allocation2 + $0x3] ss:$8 sm:$0xf]  ;;  %v1146_v50 = vld [vmem:[#allocation2 + $0x4] ss:$8 sm:$0xf] }
 0x137   :  { %v252_v61 = vld [vmem:[#allocation2] ss:$8 sm:$0xf0]  ;;  %v475_v3 = vld [vmem:[#allocation2 + $0x1] ss:$8 sm:$0xf0] }
 0x138   :  { %v253_v62 = vor.u32 %v252_v61, %v251_v60  ;;  %v476_v6 = vor.u32 %v475_v3, %v474_v5  ;;  %v699_v20 = vld [vmem:[#allocation2 + $0x2] ss:$8 sm:$0xf0]  ;;  %v923_v36 = vld [vmem:[#allocation2 + $0x3] ss:$8 sm:$0xf0] }
 0x139   :  { %v700_v23 = vor.u32 %v699_v20, %v698_v21  ;;  %v924_v39 = vor.u32 %v923_v36, %v922_v38  ;;  %v1147_v49 = vld [vmem:[#allocation2 + $0x4] ss:$8 sm:$0xf0]  ;;  %v1371_v60 = vld [vmem:[#allocation2 + $0x5] ss:$8 sm:$0xf0] }
 0x13a   :  { %v326_v63 = vadd.f32 %v322_v58, %v253_v62  ;;  %v1148_v51 = vor.u32 %v1147_v49, %v1146_v50  ;;  %v1370_v61 = vld [vmem:[#allocation2 + $0x5] ss:$8 sm:$0xf] }
 0x13b   :  { %v1372_v62 = vor.u32 %v1371_v60, %v1370_v61  ;;  %v2044_v38 = vld [vmem:[#allocation9 + $0x18] sm:$0xff] }
 0x13c   :  { %3232 = vtanh.f32 %v326_v63 }
 0x146   :  { %v3233_v2 = vpop.eup %3232 }
 0x147   :  { %2478 = vmatmul.mubr.msk.f32.vlgmr.msra.gmra.mrb[8].mxu0 %vm242_vm3, %v3233_v2  ;;  %2497 = vmatmul.mubr.msk.f32.vlgmr.msra.gmra.mrb[2].mxu1 %vm242_vm3, %v3233_v2 }
 0x148   :  { %2948 = vmatpush3.bf16.msra.mxu1 %v3564_v19  ;;  %2972 = vmatpush3.bf16.msra.mxu0 %v3528_v8 }
 0x149   :  { %2949 = vmatprep.subr.bf16.mxu1 %v3388_v0  ;;  %2973 = vmatprep.subr.bf16.mxu0 %v3388_v0 }
 0x14a   :  { %2515 = vmatprep.mubr.msk.f32.mxu1 %vm3389_vm0, %v3390_v1  ;;  %2553 = vmatprep.mubr.msk.f32.mxu0 %vm3389_vm0, %v3390_v1 }
 0x14c   :  { %2951 = vmatpush3.bf16.msra.mxu1 %v3568_v22  ;;  %2975 = vmatpush3.bf16.msra.mxu0 %v3533_v10 }
 0x14d   :  { %2952 = vmatprep.subr.bf16.mxu1 %v3388_v0  ;;  %2976 = vmatprep.subr.bf16.mxu0 %v3388_v0 }
 0x150   :  { %2954 = vmatpush3.bf16.msra.mxu1 %v3572_v25  ;;  %2978 = vmatpush3.bf16.msra.mxu0 %v3539_v13 }
 0x151   :  { %2955 = vmatprep.subr.bf16.mxu1 %v3388_v0  ;;  %2979 = vmatprep.subr.bf16.mxu0 %v3388_v0 }
 0x154   :  { %2957 = vmatpush3.bf16.msra.mxu1 %v3576_v28  ;;  %2981 = vmatpush3.bf16.msra.mxu0 %v3545_v16 }
 0x155   :  { %2958 = vmatprep.subr.bf16.mxu1 %v3388_v0  ;;  %2982 = vmatprep.subr.bf16.mxu0 %v3388_v0 }
 0x21a   :  { %v467_v7 = vpop.f32.mrb[8].mxu0  ;;  %v543_v9 = vpop.f32.mrb[2].mxu1 }
 0x21b   :  { %v3198_v11 = vadd.f32 %v467_v7, %v3635_v4  ;;  %v547_v12 = vadd.f32 %v543_v9, %v476_v6  ;;  %v2479_v14 = vpop.f32.mrb[9].mxu0  ;;  %v2498_v15 = vpop.f32.mrb[3].mxu1 }
 0x21c   :  { %v1594_v14 = vld [vmem:[#allocation2 + $0x6] ss:$8 sm:$0xf] }
 0x21d   :  { %3234 = vtanh.f32 %v3198_v11 }
 0x21e   :  { %3236 = vtanh.f32 %v547_v12  ;;  %v1595_v12 = vld [vmem:[#allocation2 + $0x6] ss:$8 sm:$0xf0] }
 0x227   :  { %v3235_v17 = vpop.eup %3234 }
 0x228   :  { %v3237_v18 = vpop.eup %3236  ;;  %2516 = vmatmul.mubr.msk.f32.vlgmr.msra.gmra.mrb[4].mxu1 %vm242_vm3, %v3235_v17 }
 0x229   :  { %2960 = vmatpush3.bf16.msra.mxu1 %v3580_v31  ;;  %2554 = vmatmul.mubr.msk.f32.vlgmr.msra.gmra.mrb[10].mxu0 %vm242_vm3, %v3237_v18 }
 0x22a   :  { %2961 = vmatprep.subr.bf16.mxu1 %v3388_v0  ;;  %2534 = vmatprep.mubr.msk.f32.mxu1 %vm3389_vm0, %v3390_v1 }
 0x22b   :  { %2984 = vmatpush3.bf16.msra.mxu0 %v3564_v19  ;;  %2572 = vmatprep.mubr.msk.f32.mxu0 %vm3389_vm0, %v3390_v1 }
 0x22c   :  { %2985 = vmatprep.subr.bf16.mxu0 %v3388_v0 }
 0x22d   :  { %2963 = vmatpush3.bf16.msra.mxu1 %v3587_v34 }
 0x22e   :  { %2964 = vmatprep.subr.bf16.mxu1 %v3388_v0 }
 0x22f   :  { %2987 = vmatpush3.bf16.msra.mxu0 %v3568_v22 }
 0x230   :  { %2988 = vmatprep.subr.bf16.mxu0 %v3388_v0 }
 0x231   :  { %2966 = vmatpush3.bf16.msra.mxu1 %v3591_v37 }
 0x232   :  { %2967 = vmatprep.subr.bf16.mxu1 %v3388_v0 }
 0x233   :  { %2990 = vmatpush3.bf16.msra.mxu0 %v3572_v25 }
 0x234   :  { %2991 = vmatprep.subr.bf16.mxu0 %v3388_v0 }
 0x235   :  { %2969 = vmatpush3.bf16.msra.mxu1 %v3594_v40 }
 0x236   :  { %3006 = vmatprep.subr.bf16.mxu1 %v3388_v0 }
 0x237   :  { %2993 = vmatpush3.bf16.msra.mxu0 %v3576_v28 }
 0x238   :  { %2535 = vmatmul.mubr.msk.f32.vlgmr.msra.gmra.mrb[4].mxu1 %vm242_vm3, %v3237_v18  ;;  %2994 = vmatprep.subr.bf16.mxu0 %v3388_v0 }
 0x239   :  { %3008 = vmatpush3.bf16.msra.mxu1 %v3528_v8  ;;  %2610 = vmatprep.mubr.msk.f32.mxu1 %vm3389_vm0, %v3390_v1 }
 0x23a   :  { %3009 = vmatprep.subr.bf16.mxu1 %v3388_v0 }
 0x23d   :  { %3011 = vmatpush3.bf16.msra.mxu1 %v3533_v10 }
 0x23e   :  { %3012 = vmatprep.subr.bf16.mxu1 %v3388_v0 }
 0x241   :  { %3014 = vmatpush3.bf16.msra.mxu1 %v3539_v13 }
 0x242   :  { %3015 = vmatprep.subr.bf16.mxu1 %v3388_v0 }
 0x245   :  { %3017 = vmatpush3.bf16.msra.mxu1 %v3545_v16 }
 0x246   :  { %3018 = vmatprep.subr.bf16.mxu1 %v3388_v0 }
 0x2fc   :  { %v767_v24 = vpop.f32.mrb[10].mxu0 }
 0x2fd   :  { %v771_v26 = vadd.f32 %v767_v24, %v700_v23  ;;  %v2555_v27 = vpop.f32.mrb[11].mxu0 }
 0x2ff   :  { %3238 = vtanh.f32 %v771_v26 }
 0x309   :  { %v3239_v29 = vpop.eup %3238 }
 0x30a   :  { %2611 = vmatmul.mubr.msk.f32.vlgmr.msra.gmra.mrb[6].mxu1 %vm242_vm3, %v3239_v29 }
 0x30b   :  { %v691_v30 = vpop.f32.mrb[4].mxu1  ;;  %3020 = vmatpush3.bf16.msra.mxu1 %v3564_v19  ;;  %2629 = vmatprep.mubr.msk.f32.mxu1 %vm3389_vm0, %v3390_v1 }
 0x30c   :  { %v3199_v32 = vadd.f32 %v691_v30, %v3635_v4  ;;  %v2536_v33 = vpop.f32.mrb[5].mxu1  ;;  %3021 = vmatprep.subr.bf16.mxu1 %v3388_v0  ;;  %v1818_v30 = vld [vmem:[#allocation2 + $0x7] ss:$8 sm:$0xf] }
 0x30e   :  { %3240 = vtanh.f32 %v3199_v32 }
 0x30f   :  { %3023 = vmatpush3.bf16.msra.mxu1 %v3568_v22 }
 0x310   :  { %3024 = vmatprep.subr.bf16.mxu1 %v3388_v0 }
 0x313   :  { %3026 = vmatpush3.bf16.msra.mxu1 %v3572_v25 }
 0x314   :  { %3027 = vmatprep.subr.bf16.mxu1 %v3388_v0 }
 0x317   :  { %3029 = vmatpush3.bf16.msra.mxu1 %v3576_v28 }
 0x318   :  { %v3241_v35 = vpop.eup %3240  ;;  %3030 = vmatprep.subr.bf16.mxu1 %v3388_v0 }
 0x319   :  { %2573 = vmatmul.mubr.msk.f32.vlgmr.msra.gmra.mrb[12].mxu0 %vm242_vm3, %v3241_v35 }
 0x31a   :  { %2996 = vmatpush3.bf16.msra.mxu0 %v3580_v31  ;;  %2591 = vmatprep.mubr.msk.f32.mxu0 %vm3389_vm0, %v3390_v1 }
 0x31b   :  { %2997 = vmatprep.subr.bf16.mxu0 %v3388_v0 }
 0x31e   :  { %2999 = vmatpush3.bf16.msra.mxu0 %v3587_v34 }
 0x31f   :  { %3000 = vmatprep.subr.bf16.mxu0 %v3388_v0 }
 0x322   :  { %3002 = vmatpush3.bf16.msra.mxu0 %v3591_v37 }
 0x323   :  { %3003 = vmatprep.subr.bf16.mxu0 %v3388_v0 }
 0x326   :  { %3005 = vmatpush3.bf16.msra.mxu0 %v3594_v40 }
 0x327   :  { %3042 = vmatprep.subr.bf16.mxu0 %v3388_v0 }
 0x329   :  { %2592 = vmatmul.mubr.msk.f32.vlgmr.msra.gmra.mrb[12].mxu0 %vm242_vm3, %v3239_v29  ;;  %v1819_v29 = vld [vmem:[#allocation2 + $0x7] ss:$8 sm:$0xf0] }
 0x32a   :  { %3044 = vmatpush3.bf16.msra.mxu0 %v3528_v8  ;;  %2667 = vmatprep.mubr.msk.f32.mxu0 %vm3389_vm0, %v3390_v1  ;;  %v1820_v33 = vor.u32 %v1819_v29, %v1818_v30 }
 0x32b   :  { %3045 = vmatprep.subr.bf16.mxu0 %v3388_v0 }
 0x32e   :  { %3047 = vmatpush3.bf16.msra.mxu0 %v3533_v10 }
 0x32f   :  { %3048 = vmatprep.subr.bf16.mxu0 %v3388_v0 }
 0x332   :  { %3050 = vmatpush3.bf16.msra.mxu0 %v3539_v13 }
 0x333   :  { %3051 = vmatprep.subr.bf16.mxu0 %v3388_v0 }
 0x336   :  { %3053 = vmatpush3.bf16.msra.mxu0 %v3545_v16 }
 0x337   :  { %3054 = vmatprep.subr.bf16.mxu0 %v3388_v0 }
 0x3dd   :  { %v991_v41 = vpop.f32.mrb[6].mxu1 }
 0x3de   :  { %v995_v42 = vadd.f32 %v991_v41, %v924_v39  ;;  %v2612_v43 = vpop.f32.mrb[7].mxu1  ;;  %v2046_v41 = vld [vmem:[#allocation9 + $0x28] sm:$0xff] }
 0x3df   :  { %v2048_v43 = vld [vmem:[#allocation9 + $0x38] sm:$0xff] }
 0x3e0   :  { %3242 = vtanh.f32 %v995_v42  ;;  %v2047_v42 = vld [vmem:[#allocation9 + $0x30] sm:$0xff] }
 0x3ea   :  { %v3243_v44 = vpop.eup %3242 }
 0x3eb   :  { %2668 = vmatmul.mubr.msk.f32.vlgmr.msra.gmra.mrb[14].mxu0 %vm242_vm3, %v3243_v44 }
 0x3ec   :  { %3056 = vmatpush3.bf16.msra.mxu0 %v3564_v19  ;;  %2686 = vmatprep.mubr.msk.f32.mxu0 %vm3389_vm0, %v3390_v1 }
 0x3ed   :  { %3057 = vmatprep.subr.bf16.mxu0 %v3388_v0 }
 0x3f0   :  { %3059 = vmatpush3.bf16.msra.mxu0 %v3568_v22 }
 0x3f1   :  { %3060 = vmatprep.subr.bf16.mxu0 %v3388_v0 }
 0x3f4   :  { %3062 = vmatpush3.bf16.msra.mxu0 %v3572_v25 }
 0x3f5   :  { %3063 = vmatprep.subr.bf16.mxu0 %v3388_v0 }
 0x3f8   :  { %3065 = vmatpush3.bf16.msra.mxu0 %v3576_v28 }
 0x3f9   :  { %3066 = vmatprep.subr.bf16.mxu0 %v3388_v0 }
 0x3fc   :  { %v915_v45 = vpop.f32.mrb[12].mxu0 }
 0x3fd   :  { %v3200_v46 = vadd.f32 %v915_v45, %v3635_v4  ;;  %v2593_v47 = vpop.f32.mrb[13].mxu0 }
 0x3fe   :  { %v2173_v47 = vld [vmem:[%s3873_s8] ss:$0 sm:$0xff] }
 0x3ff   :  { %3244 = vtanh.f32 %v3200_v46 }
 0x409   :  { %v3245_v48 = vpop.eup %3244 }
 0x40a   :  { %2630 = vmatmul.mubr.msk.f32.vlgmr.msra.gmra.mrb[8].mxu1 %vm242_vm3, %v3245_v48 }
 0x40b   :  { %3032 = vmatpush3.bf16.msra.mxu1 %v3580_v31  ;;  %2648 = vmatprep.mubr.msk.f32.mxu1 %vm3389_vm0, %v3390_v1 }
 0x40c   :  { %3033 = vmatprep.subr.bf16.mxu1 %v3388_v0 }
 0x40f   :  { %3035 = vmatpush3.bf16.msra.mxu1 %v3587_v34 }
 0x410   :  { %3036 = vmatprep.subr.bf16.mxu1 %v3388_v0 }
 0x413   :  { %3038 = vmatpush3.bf16.msra.mxu1 %v3591_v37 }
 0x414   :  { %3039 = vmatprep.subr.bf16.mxu1 %v3388_v0 }
 0x417   :  { %3041 = vmatpush3.bf16.msra.mxu1 %v3594_v40 }
 0x418   :  { %3078 = vmatprep.subr.bf16.mxu1 %v3388_v0 }
 0x41a   :  { %2649 = vmatmul.mubr.msk.f32.vlgmr.msra.gmra.mrb[8].mxu1 %vm242_vm3, %v3243_v44 }
 0x41b   :  { %3080 = vmatpush3.bf16.msra.mxu1 %v3528_v8  ;;  %2724 = vmatprep.mubr.msk.f32.mxu1 %vm3389_vm0, %v3390_v1 }
 0x41c   :  { %3081 = vmatprep.subr.bf16.mxu1 %v3388_v0 }
 0x41f   :  { %3083 = vmatpush3.bf16.msra.mxu1 %v3533_v10 }
 0x420   :  { %3084 = vmatprep.subr.bf16.mxu1 %v3388_v0 }
 0x423   :  { %3086 = vmatpush3.bf16.msra.mxu1 %v3539_v13 }
 0x424   :  { %3087 = vmatprep.subr.bf16.mxu1 %v3388_v0 }
 0x427   :  { %3089 = vmatpush3.bf16.msra.mxu1 %v3545_v16 }
 0x428   :  { %3090 = vmatprep.subr.bf16.mxu1 %v3388_v0 }
 0x4be   :  { %v1215_v52 = vpop.f32.mrb[14].mxu0 }
 0x4bf   :  { %v1219_v53 = vadd.f32 %v1215_v52, %v1148_v51  ;;  %v2669_v54 = vpop.f32.mrb[15].mxu0 }
 0x4c1   :  { %3246 = vtanh.f32 %v1219_v53 }
 0x4cb   :  { %v3247_v55 = vpop.eup %3246 }
 0x4cc   :  { %2725 = vmatmul.mubr.msk.f32.vlgmr.msra.gmra.mrb[10].mxu1 %vm242_vm3, %v3247_v55 }
 0x4cd   :  { %3092 = vmatpush3.bf16.msra.mxu1 %v3564_v19  ;;  %2743 = vmatprep.mubr.msk.f32.mxu1 %vm3389_vm0, %v3390_v1 }
 0x4ce   :  { %3093 = vmatprep.subr.bf16.mxu1 %v3388_v0 }
 0x4d1   :  { %3095 = vmatpush3.bf16.msra.mxu1 %v3568_v22 }
 0x4d2   :  { %3096 = vmatprep.subr.bf16.mxu1 %v3388_v0 }
 0x4d5   :  { %3098 = vmatpush3.bf16.msra.mxu1 %v3572_v25 }
 0x4d6   :  { %3099 = vmatprep.subr.bf16.mxu1 %v3388_v0 }
 0x4d9   :  { %3101 = vmatpush3.bf16.msra.mxu1 %v3576_v28 }
 0x4da   :  { %3102 = vmatprep.subr.bf16.mxu1 %v3388_v0 }
 0x4ed   :  { %v1139_v56 = vpop.f32.mrb[8].mxu1 }
 0x4ee   :  { %v3201_v57 = vadd.f32 %v1139_v56, %v3635_v4  ;;  %v2650_v58 = vpop.f32.mrb[9].mxu1 }
 0x4f0   :  { %3248 = vtanh.f32 %v3201_v57 }
 0x4fa   :  { %v3249_v59 = vpop.eup %3248 }
 0x4fb   :  { %2687 = vmatmul.mubr.msk.f32.vlgmr.msra.gmra.mrb[16].mxu0 %vm242_vm3, %v3249_v59 }
 0x4fc   :  { %3068 = vmatpush3.bf16.msra.mxu0 %v3580_v31  ;;  %2705 = vmatprep.mubr.msk.f32.mxu0 %vm3389_vm0, %v3390_v1 }
 0x4fd   :  { %3069 = vmatprep.subr.bf16.mxu0 %v3388_v0 }
 0x500   :  { %3071 = vmatpush3.bf16.msra.mxu0 %v3587_v34 }
 0x501   :  { %3072 = vmatprep.subr.bf16.mxu0 %v3388_v0 }
 0x504   :  { %3074 = vmatpush3.bf16.msra.mxu0 %v3591_v37 }
 0x505   :  { %3075 = vmatprep.subr.bf16.mxu0 %v3388_v0 }
 0x508   :  { %3077 = vmatpush3.bf16.msra.mxu0 %v3594_v40 }
 0x509   :  { %3114 = vmatprep.subr.bf16.mxu0 %v3388_v0 }
 0x50b   :  { %2706 = vmatmul.mubr.msk.f32.vlgmr.msra.gmra.mrb[16].mxu0 %vm242_vm3, %v3247_v55 }
 0x50c   :  { %3116 = vmatpush3.bf16.msra.mxu0 %v3528_v8  ;;  %2781 = vmatprep.mubr.msk.f32.mxu0 %vm3389_vm0, %v3390_v1 }
 0x50d   :  { %3117 = vmatprep.subr.bf16.mxu0 %v3388_v0 }
 0x510   :  { %3119 = vmatpush3.bf16.msra.mxu0 %v3533_v10 }
 0x511   :  { %3120 = vmatprep.subr.bf16.mxu0 %v3388_v0 }
 0x514   :  { %3122 = vmatpush3.bf16.msra.mxu0 %v3539_v13 }
 0x515   :  { %3123 = vmatprep.subr.bf16.mxu0 %v3388_v0 }
 0x518   :  { %3125 = vmatpush3.bf16.msra.mxu0 %v3545_v16 }
 0x519   :  { %3126 = vmatprep.subr.bf16.mxu0 %v3388_v0 }
 0x59f   :  { %v1439_v63 = vpop.f32.mrb[10].mxu1 }
 0x5a0   :  { %v1443_v2 = vadd.f32 %v1439_v63, %v1372_v62  ;;  %v2726_v3 = vpop.f32.mrb[11].mxu1 }
 0x5a2   :  { %3250 = vtanh.f32 %v1443_v2 }
 0x5ac   :  { %v3251_v5 = vpop.eup %3250 }
 0x5ad   :  { %2782 = vmatmul.mubr.msk.f32.vlgmr.msra.gmra.mrb[18].mxu0 %vm242_vm3, %v3251_v5 }
 0x5ae   :  { %3128 = vmatpush3.bf16.msra.mxu0 %v3564_v19  ;;  %2800 = vmatprep.mubr.msk.f32.mxu0 %vm3389_vm0, %v3390_v1 }
 0x5af   :  { %3129 = vmatprep.subr.bf16.mxu0 %v3388_v0 }
 0x5b2   :  { %3131 = vmatpush3.bf16.msra.mxu0 %v3568_v22 }
 0x5b3   :  { %3132 = vmatprep.subr.bf16.mxu0 %v3388_v0 }
 0x5b6   :  { %3134 = vmatpush3.bf16.msra.mxu0 %v3572_v25 }
 0x5b7   :  { %3135 = vmatprep.subr.bf16.mxu0 %v3388_v0 }
 0x5ba   :  { %3137 = vmatpush3.bf16.msra.mxu0 %v3576_v28 }
 0x5bb   :  { %3138 = vmatprep.subr.bf16.mxu0 %v3388_v0 }
 0x5de   :  { %v1363_v6 = vpop.f32.mrb[16].mxu0 }
 0x5df   :  { %v3202_v7 = vadd.f32 %v1363_v6, %v3635_v4  ;;  %v2707_v9 = vpop.f32.mrb[17].mxu0 }
 0x5e1   :  { %3252 = vtanh.f32 %v3202_v7 }
 0x5eb   :  { %v3253_v11 = vpop.eup %3252 }
 0x5ec   :  { %2744 = vmatmul.mubr.msk.f32.vlgmr.msra.gmra.mrb[12].mxu1 %vm242_vm3, %v3253_v11 }
 0x5ed   :  { %3104 = vmatpush3.bf16.msra.mxu1 %v3580_v31  ;;  %2762 = vmatprep.mubr.msk.f32.mxu1 %vm3389_vm0, %v3390_v1 }
 0x5ee   :  { %3105 = vmatprep.subr.bf16.mxu1 %v3388_v0 }
 0x5f1   :  { %3107 = vmatpush3.bf16.msra.mxu1 %v3587_v34 }
 0x5f2   :  { %3108 = vmatprep.subr.bf16.mxu1 %v3388_v0 }
 0x5f5   :  { %3110 = vmatpush3.bf16.msra.mxu1 %v3591_v37 }
 0x5f6   :  { %3111 = vmatprep.subr.bf16.mxu1 %v3388_v0 }
 0x5f9   :  { %3113 = vmatpush3.bf16.msra.mxu1 %v3594_v40 }
 0x5fa   :  { %3150 = vmatprep.subr.bf16.mxu1 %v3388_v0 }
 0x5fc   :  { %2763 = vmatmul.mubr.msk.f32.vlgmr.msra.gmra.mrb[12].mxu1 %vm242_vm3, %v3251_v5 }
 0x5fd   :  { %3152 = vmatpush3.bf16.msra.mxu1 %v3528_v8  ;;  %2838 = vmatprep.mubr.msk.f32.mxu1 %vm3389_vm0, %v3390_v1  ;;  %v1596_v8 = vor.u32 %v1595_v12, %v1594_v14 }
 0x5fe   :  { %3153 = vmatprep.subr.bf16.mxu1 %v3388_v0 }
 0x601   :  { %3155 = vmatpush3.bf16.msra.mxu1 %v3533_v10 }
 0x602   :  { %3156 = vmatprep.subr.bf16.mxu1 %v3388_v0 }
 0x605   :  { %3158 = vmatpush3.bf16.msra.mxu1 %v3539_v13 }
 0x606   :  { %3159 = vmatprep.subr.bf16.mxu1 %v3388_v0 }
 0x609   :  { %3161 = vmatpush3.bf16.msra.mxu1 %v3545_v16 }
 0x60a   :  { %3162 = vmatprep.subr.bf16.mxu1 %v3388_v0 }
 0x680   :  { %v1663_v15 = vpop.f32.mrb[18].mxu0 }
 0x681   :  { %v1667_v17 = vadd.f32 %v1663_v15, %v1596_v8  ;;  %v2783_v18 = vpop.f32.mrb[19].mxu0 }
 0x683   :  { %3254 = vtanh.f32 %v1667_v17 }
 0x68d   :  { %v3255_v20 = vpop.eup %3254 }
 0x68e   :  { %2839 = vmatmul.mubr.msk.f32.vlgmr.msra.gmra.mrb[14].mxu1 %vm242_vm3, %v3255_v20 }
 0x68f   :  { %3164 = vmatpush3.bf16.msra.mxu1 %v3564_v19  ;;  %2857 = vmatprep.mubr.msk.f32.mxu1 %vm3389_vm0, %v3390_v1 }
 0x690   :  { %3165 = vmatprep.subr.bf16.mxu1 %v3388_v0 }
 0x693   :  { %3167 = vmatpush3.bf16.msra.mxu1 %v3568_v22  ;;  %v2041_v22 = vld [vmem:[#allocation9] sm:$0xff] }
 0x694   :  { %3168 = vmatprep.subr.bf16.mxu1 %v3388_v0 }
 0x697   :  { %3170 = vmatpush3.bf16.msra.mxu1 %v3572_v25  ;;  %v2042_v25 = vld [vmem:[#allocation9 + $0x8] sm:$0xff] }
 0x698   :  { %3171 = vmatprep.subr.bf16.mxu1 %v3388_v0 }
 0x69b   :  { %3173 = vmatpush3.bf16.msra.mxu1 %v3576_v28  ;;  %v3187_v28 = vpack.c.bf16 %v2042_v25, %v2041_v22 }
 0x69c   :  { %3174 = vmatprep.subr.bf16.mxu1 %v3388_v0 }
 0x6cf   :  { %v1587_v10 = vpop.f32.mrb[12].mxu1 }
 0x6d0   :  { %v3203_v13 = vadd.f32 %v1587_v10, %v3635_v4  ;;  %v2764_v16 = vpop.f32.mrb[13].mxu1 }
 0x6d2   :  { %3256 = vtanh.f32 %v3203_v13 }
 0x6dc   :  { %v3257_v19 = vpop.eup %3256 }
 0x6dd   :  { %2801 = vmatmul.mubr.msk.f32.vlgmr.msra.gmra.mrb[20].mxu0 %vm242_vm3, %v3257_v19 }
 0x6de   :  { %3140 = vmatpush3.bf16.msra.mxu0 %v3580_v31  ;;  %2819 = vmatprep.mubr.msk.f32.mxu0 %vm3389_vm0, %v3390_v1 }
 0x6df   :  { %3141 = vmatprep.subr.bf16.mxu0 %v3388_v0 }
 0x6e2   :  { %3143 = vmatpush3.bf16.msra.mxu0 %v3587_v34 }
 0x6e3   :  { %3144 = vmatprep.subr.bf16.mxu0 %v3388_v0 }
 0x6e6   :  { %3146 = vmatpush3.bf16.msra.mxu0 %v3591_v37 }
 0x6e7   :  { %3147 = vmatprep.subr.bf16.mxu0 %v3388_v0 }
 0x6ea   :  { %3149 = vmatpush3.bf16.msra.mxu0 %v3594_v40 }
 0x6eb   :  { %3186 = vmatprep.subr.bf16.mxu0 %v3388_v0 }
 0x6ed   :  { %2820 = vmatmul.mubr.msk.f32.vlgmr.msra.gmra.mrb[20].mxu0 %vm242_vm3, %v3255_v20 }
 0x6ee   :  { %2895 = vmatprep.mubr.msk.f32.mxu0 %vm3389_vm0, %v3390_v1  ;;  %3188 = vmatpush3.bf16.msra.mxu0 %v3187_v28 }
 0x6ef   :  { %3189 = vmatprep.subr.bf16.mxu0 %v3388_v0 }
 0x761   :  { %v1887_v21 = vpop.f32.mrb[14].mxu1 }
 0x762   :  { %v2840_v23 = vpop.f32.mrb[15].mxu1  ;;  %v1891_v35 = vadd.f32 %v1887_v21, %v1820_v33 }
 0x7c0   :  { %v1811_v24 = vpop.f32.mrb[20].mxu0 }
 0x7c1   :  { %v3204_v26 = vadd.f32 %v1811_v24, %v3635_v4  ;;  %v2821_v27 = vpop.f32.mrb[21].mxu0 }
 0x7c3   :  { %3258 = vtanh.f32 %v3204_v26 }
 0x7c4   :  { %3260 = vtanh.f32 %v1891_v35 }
 0x7cd   :  { %v3259_v32 = vpop.eup %3258 }
 0x7ce   :  { %2858 = vmatmul.mubr.msk.f32.vlgmr.msra.gmra.mrb[16].mxu1 %vm242_vm3, %v3259_v32  ;;  %v3261_v36 = vpop.eup %3260 }
 0x7cf   :  { %3176 = vmatpush3.bf16.msra.mxu1 %v3580_v31  ;;  %2876 = vmatprep.mubr.msk.f32.mxu1 %vm3389_vm0, %v3390_v1  ;;  %v2043_v31 = vld [vmem:[#allocation9 + $0x10] sm:$0xff]  ;;  %v2045_v1 = vld [vmem:[#allocation9 + $0x20] sm:$0xff] }
 0x7d0   :  { %3177 = vmatprep.subr.bf16.mxu1 %v3388_v0  ;;  %v3190_v39 = vpack.c.bf16 %v2044_v38, %v2043_v31 }
 0x7d2   :  { %3191 = vmatpush3.bf16.msra.mxu0 %v3190_v39 }
 0x7d3   :  { %3179 = vmatpush3.bf16.msra.mxu1 %v3587_v34  ;;  %3192 = vmatprep.subr.bf16.mxu0 %v3388_v0  ;;  %v3193_v34 = vpack.c.bf16 %v2046_v41, %v2045_v1 }
 0x7d4   :  { %3180 = vmatprep.subr.bf16.mxu1 %v3388_v0 }
 0x7d6   :  { %3194 = vmatpush3.bf16.msra.mxu0 %v3193_v34 }
 0x7d7   :  { %3182 = vmatpush3.bf16.msra.mxu1 %v3591_v37  ;;  %v3196_v37 = vpack.c.bf16 %v2048_v43, %v2047_v42  ;;  %3195 = vmatprep.subr.bf16.mxu0 %v3388_v0 }
 0x7d8   :  { %3183 = vmatprep.subr.bf16.mxu1 %v3388_v0 }
 0x7da   :  { %3197 = vmatpush3.bf16.msra.mxu0 %v3196_v37 }
 0x7db   :  { %3185 = vmatpush3.bf16.msra.mxu1 %v3594_v40 }
 0x7de   :  { %2877 = vmatmul.mubr.msk.f32.vlgmr.msra.gmra.mrb[16].mxu1 %vm242_vm3, %v3261_v36 }
 0x8b1   :  { %v2035_v40 = vpop.f32.mrb[16].mxu1 }
 0x8b2   :  { %v3205_v44 = vadd.f32 %v2035_v40, %v3635_v4  ;;  %v2878_v45 = vpop.f32.mrb[17].mxu1 }
 0x8b4   :  { %3262 = vtanh.f32 %v3205_v44 }
 0x8be   :  { %v3263_v46 = vpop.eup %3262 }
 0x8bf   :  { %2896 = vmatmul.mubr.msk.f32.vlgmr.msra.gmra.mrb[22].mxu0 %vm242_vm3, %v3263_v46 }
 0x992   :  { %v2125_v48 = vpop.f32.mrb[22].mxu0 }
 0x993   :  { %v2126_v49 = vadd.f32 %v2173_v47, %v2125_v48  ;;  %v2897_v50 = vpop.f32.mrb[23].mxu0 }
 0x995   :  { %2129 = vst [vmem:[#allocation11] sm:$0xff] %v2126_v49 }
 0x996   :  { %3363 = shalt.err (!%p3360_p8)
}
 0x997   :  { %s3364_s12 = scalar_lea.hbm %s3874_s9, 128 }
 0x998   :  { %p3365_p9 = scmp.ne.s32.totalorder %s3874_s9, %s3364_s12  ;;  %p3368_p10 = scmp.lt.u32.totalorder %s3364_s12, %s3874_s9 }
 0x99a   :  { %p3370_p11 = pnand %p3368_p10, %p3365_p9 }
 0x99c   :  { %3373 = shalt.err (!%p3370_p11)
}
 0x99d   :  { %2139 = dma.vmem_to_hbm [thread:$0]  %s2137_s24, 128, %s3874_s9, [#allocation5]  }
 0x99e   :  { %3380 = dma.done.wait [#allocation5], 128  }
 0x99f   :  { %3381 = vsyncadd [#allocation5], 4294967168 }
 0x9a0   :  { %2143 = vsyncpa [#allocation4], 1 }
 0x9a1   :  { %2144 = vsyncpa [#allocation7], 1 }
 0x9a2   :  { %2145 = vsyncpa [#allocation10], 1 }
 0x9a3   :  { %2146 = vsyncpa [#allocation5], 1 }

</bundles_post_ra>
